<compile_context>
chip_gen: v6e
topology: v6e:2x2x1
jax: 0.10.0
libtpu: 0.0.40
codegen_flags: <defaults>
</compile_context>

<pallas_src>
import functools

import jax
import jax.numpy as jnp
from jax import lax
from jax.experimental import pallas as pl
from jax.experimental.pallas import tpu as pltpu


def _chamfer_kernel(pa_ref, ga_ref, fwd_ref, bwd_ref, rowmin_ref,
                    *, m_real, n_real, tile_n):
    """pa_ref: (5, Mp)  rows = [-2*p ; |p|^2 ; 1]
       ga_ref: (5, TN)  rows = [ g   ;  1    ; |g|^2]
       fwd_ref: (1, 1)  per-batch sum of predict->gt NN distances (last tile)
       bwd_ref: (1, 1)  per-batch sum of gt->predict NN distances (accumulated)
       rowmin_ref: (Mp, 1) running min_j d2 across gt tiles (VMEM scratch)"""
    n = pl.program_id(1)

    @pl.when(n == 0)
    def _():
        rowmin_ref[...] = jnp.full_like(rowmin_ref, jnp.inf)
        bwd_ref[...] = jnp.zeros_like(bwd_ref)

    # Full squared-distance tile from ONE MXU matmul (K = 5):
    #   d2[i, j] = -2 p_i.g_j + |p_i|^2 + |g_j|^2
    d2 = lax.dot_general(
        pa_ref[...], ga_ref[...],
        dimension_numbers=(((0,), (0,)), ((), ())),
        preferred_element_type=jnp.float32,
        precision=lax.Precision.HIGHEST,
    )                                                    # (Mp, TN)

    tile_rowmin = jnp.min(d2, axis=1, keepdims=True)     # (Mp, 1)  XLU
    tile_colmin = jnp.min(d2, axis=0, keepdims=True)     # (1, TN)  XLU

    rowmin_ref[...] = jnp.minimum(rowmin_ref[...], tile_rowmin)

    # Backward direction: nearest predict point for each REAL gt column of the
    # tile; padded columns (>= n_real) are masked out of the partial sum.
    col_d = jnp.sqrt(jnp.maximum(tile_colmin, 0.0) + 1e-8)          # (1, TN)
    col_idx = n * tile_n + lax.broadcasted_iota(jnp.int32, col_d.shape, 1)
    col_valid = col_idx < n_real
    bwd_ref[...] += jnp.sum(jnp.where(col_valid, col_d, 0.0), keepdims=True)

    # Forward direction: finalize once every gt tile has been folded in.
    @pl.when(n == pl.num_programs(1) - 1)
    def _():
        row_d = jnp.sqrt(jnp.maximum(rowmin_ref[...], 0.0) + 1e-8)  # (Mp, 1)
        row_idx = lax.broadcasted_iota(jnp.int32, row_d.shape, 0)
        row_valid = row_idx < m_real
        fwd_ref[...] = jnp.sum(jnp.where(row_valid, row_d, 0.0), keepdims=True)


def chamfer_loss(predict_pc, gt_pc, *, tile_n=512):
    """predict_pc: (B, 3, M) array, or tuple/list whose [0] is (matching the
    original `predict_pc = predict_pc[0]`).  gt_pc: (B, 3, N).  Returns scalar."""
    if isinstance(predict_pc, (tuple, list)):
        predict_pc = predict_pc[0]
    B, C, M = predict_pc.shape
    Bg, Cg, N = gt_pc.shape
    assert C == 3 and Cg == 3 and B == Bg

    p = predict_pc.astype(jnp.float32)       # (B, 3, M)  native, lane-dense
    g = gt_pc.astype(jnp.float32)            # (B, 3, N)

    # --- pad the predict (lane) axis to a sublane multiple --------------------
    # Far-away pad points never win a backward (column) min; their forward rows
    # are masked out of the in-kernel sum.
    m_pad = ((M + 7) // 8) * 8
    if m_pad != M:
        p = jnp.pad(p, ((0, 0), (0, 0), (0, m_pad - M)), constant_values=1.0e6)

    # --- pad / tile the gt (lane) axis ----------------------------------------
    n_pad = ((N + 127) // 128) * 128
    # Cap TN so the (Mp, TN) f32 distance tile stays around <= 4 MiB.
    vmem_cap_cols = (4 * 1024 * 1024) // max(4 * m_pad, 1)
    tn = min(tile_n, n_pad, max(128, (vmem_cap_cols // 128) * 128))
    tn = max(128, (tn // 128) * 128)
    n_pad = ((n_pad + tn - 1) // tn) * tn
    n_tiles = n_pad // tn
    if n_pad != N:
        # Far-away pad points: never a forward nearest neighbour; their
        # backward columns are masked out of the in-kernel sum.
        g = jnp.pad(g, ((0, 0), (0, 0), (0, n_pad - N)), constant_values=1.0e6)

    # --- homogeneous-coordinate augmentation (tiny, O(B*(M+N))) ---------------
    p_sq = jnp.sum(p * p, axis=1, keepdims=True)                          # (B,1,Mp)
    g_sq = jnp.sum(g * g, axis=1, keepdims=True)                          # (B,1,n_pad)
    pa = jnp.concatenate([-2.0 * p, p_sq, jnp.ones_like(p_sq)], axis=1)   # (B,5,Mp)
    ga = jnp.concatenate([g, jnp.ones_like(g_sq), g_sq], axis=1)          # (B,5,n_pad)

    kernel = functools.partial(_chamfer_kernel, m_real=M, n_real=N, tile_n=tn)

    cost = pl.CostEstimate(
        flops=2 * B * m_pad * n_pad * 5 + 3 * B * m_pad * n_pad,
        transcendentals=B * (m_pad + n_pad),
        bytes_accessed=4 * (B * 5 * m_pad + B * 5 * n_pad + 2 * B),
    )

    fwd_sum, bwd_sum = pl.pallas_call(
        kernel,
        out_shape=(jax.ShapeDtypeStruct((B, 1, 1), jnp.float32),
                   jax.ShapeDtypeStruct((B, 1, 1), jnp.float32)),
        grid_spec=pltpu.PrefetchScalarGridSpec(
            num_scalar_prefetch=0,
            grid=(B, n_tiles),
            in_specs=[
                pl.BlockSpec((None, 5, m_pad), lambda b, n: (b, 0, 0)),
                pl.BlockSpec((None, 5, tn), lambda b, n: (b, 0, n)),
            ],
            out_specs=(
                pl.BlockSpec((None, 1, 1), lambda b, n: (b, 0, 0)),
                pl.BlockSpec((None, 1, 1), lambda b, n: (b, 0, 0)),
            ),
            scratch_shapes=[pltpu.VMEM((m_pad, 1), jnp.float32)],
        ),
        compiler_params=pltpu.CompilerParams(
            dimension_semantics=("parallel", "arbitrary"),
            vmem_limit_bytes=48 * 1024 * 1024,
        ),
        cost_estimate=cost,
    )(pa, ga)

    # k == 1 in the original, so the k-mean is a no-op; equal point counts per
    # batch make the global mean equal to (sum of per-batch sums) / (B*count).
    forward_loss = jnp.sum(fwd_sum) / (B * M)
    backward_loss = jnp.sum(bwd_sum) / (B * N)
    return forward_loss + backward_loss


def chamfer_loss_ref(predict_pc, gt_pc):
    """Pure-JAX reference (mirrors the PyTorch faiss-based forward)."""
    p = jnp.transpose(predict_pc, (0, 2, 1))  # (B, M, 3)
    g = jnp.transpose(gt_pc, (0, 2, 1))       # (B, N, 3)
    d2 = jnp.sum((p[:, :, None, :] - g[:, None, :, :]) ** 2, axis=-1)  # (B, M, N)
    fwd = jnp.sqrt(jnp.min(d2, axis=2) + 1e-8).mean()
    bwd = jnp.sqrt(jnp.min(d2, axis=1) + 1e-8).mean()
    return fwd + bwd


if __name__ == "__main__":
    # The module has no learnable parameters; only the inputs are needed.
    key = jax.random.PRNGKey(0)
    k1, k2 = jax.random.split(key)
    B, M, N = 2, 64, 48
    predict_pc = jax.random.normal(k1, (B, 3, M), dtype=jnp.float32)  # B x 3 x M
    gt_pc = jax.random.normal(k2, (B, 3, N), dtype=jnp.float32)       # B x 3 x N

    # Original forward receives a tuple whose first element is the point cloud.
    loss = chamfer_loss((predict_pc,), gt_pc)
    loss = jax.block_until_ready(loss)

    ref = jax.block_until_ready(chamfer_loss_ref(predict_pc, gt_pc))
    assert jnp.allclose(loss, ref, rtol=1e-4, atol=1e-5), (loss, ref)

    print("KERNEL_OK")
</pallas_src>

<mosaic_0001>
module attributes {stable_mosaic.version = 11 : i64} {
  func.func @_chamfer_kernel(%arg0: i32, %arg1: i32, %arg2: memref<1x5x64xf32, #tpu.memory_space<vmem>>, %arg3: memref<1x5x128xf32, #tpu.memory_space<vmem>>, %arg4: memref<1x1x1xf32, #tpu.memory_space<vmem>>, %arg5: memref<1x1x1xf32, #tpu.memory_space<vmem>>, %arg6: memref<64x1xf32, #tpu.memory_space<vmem>>) attributes {dimension_semantics = [#tpu.dimension_semantics<parallel>, #tpu.dimension_semantics<arbitrary>], iteration_bounds = array<i64: 2, 1>, scalar_prefetch = 0 : i64, scratch_operands = 1 : i64, tpu.core_type = #tpu.core_type<tc>, window_params = [{transform_indices = @transform_0, window_bounds = array<i64: 1, 5, 64>}, {transform_indices = @transform_1, window_bounds = array<i64: 1, 5, 128>}, {transform_indices = @transform_2, window_bounds = array<i64: 1, 1, 1>}, {transform_indices = @transform_3, window_bounds = array<i64: 1, 1, 1>}]} {
    %c0_i32 = arith.constant 0 : i32
    %0 = arith.cmpi eq, %arg1, %c0_i32 : i32
    %1 = arith.extui %0 : i1 to i32
    %c0_i32_0 = arith.constant 0 : i32
    %2 = arith.cmpi ne, %1, %c0_i32_0 : i32
    scf.if %2 {
      %cst_24 = arith.constant 0x7F800000 : f32
      %42 = vector.broadcast %cst_24 : f32 to vector<64x1xf32>
      %c0_25 = arith.constant 0 : index
      %c0_26 = arith.constant 0 : index
      %43 = vector.load %arg6[%c0_25, %c0_26] : memref<64x1xf32, #tpu.memory_space<vmem>>, vector<64x1xf32>
      tpu.vector_store %arg6[%c0_25, %c0_26], %42 {strides = array<i32>} : memref<64x1xf32, #tpu.memory_space<vmem>>, vector<64x1xf32>,
      %cst_27 = arith.constant 0.000000e+00 : f32
      %44 = vector.broadcast %cst_27 : f32 to vector<1x1xf32>
      %c0_28 = arith.constant 0 : index
      %c0_29 = arith.constant 0 : index
      %c0_30 = arith.constant 0 : index
      %45 = vector.load %arg5[%c0_28, %c0_29, %c0_30] : memref<1x1x1xf32, #tpu.memory_space<vmem>>, vector<1x1x1xf32>
      %46 = vector.shape_cast %45 : vector<1x1x1xf32> to vector<1x1xf32>
      %47 = vector.shape_cast %44 : vector<1x1xf32> to vector<1x1x1xf32>
      tpu.vector_store %arg5[%c0_28, %c0_29, %c0_30], %47 {strides = array<i32>} : memref<1x1x1xf32, #tpu.memory_space<vmem>>, vector<1x1x1xf32>,
    } else {
    }
    %c0 = arith.constant 0 : index
    %c0_1 = arith.constant 0 : index
    %c0_2 = arith.constant 0 : index
    %3 = vector.load %arg2[%c0, %c0_1, %c0_2] : memref<1x5x64xf32, #tpu.memory_space<vmem>>, vector<1x5x64xf32>
    %4 = vector.shape_cast %3 : vector<1x5x64xf32> to vector<5x64xf32>
    %c0_3 = arith.constant 0 : index
    %c0_4 = arith.constant 0 : index
    %c0_5 = arith.constant 0 : index
    %5 = vector.load %arg3[%c0_3, %c0_4, %c0_5] : memref<1x5x128xf32, #tpu.memory_space<vmem>>, vector<1x5x128xf32>
    %6 = vector.shape_cast %5 : vector<1x5x128xf32> to vector<5x128xf32>
    %cst = arith.constant dense<0.000000e+00> : vector<64x128xf32>
    %7 = tpu.matmul %4, %6, %cst {dimension_numbers = #tpu.dot_dimension_numbers<[0], [0], [1], [1], [0, 1, 1, 1], [], []>, precision = #tpu.contract_precision<fp32>} : vector<5x64xf32>, vector<5x128xf32>, vector<64x128xf32> -> vector<64x128xf32>
    %cst_6 = arith.constant dense<0x7F800000> : vector<64xf32>
    %8 = vector.multi_reduction <minimumf>, %7, %cst_6 [1] : vector<64x128xf32> to vector<64xf32>
    %9 = vector.shape_cast %8 : vector<64xf32> to vector<64x1xf32>
    %cst_7 = arith.constant dense<0x7F800000> : vector<128xf32>
    %10 = vector.multi_reduction <minimumf>, %7, %cst_7 [0] : vector<64x128xf32> to vector<128xf32>
    %11 = vector.shape_cast %10 : vector<128xf32> to vector<1x128xf32>
    %c0_8 = arith.constant 0 : index
    %c0_9 = arith.constant 0 : index
    %12 = vector.load %arg6[%c0_8, %c0_9] : memref<64x1xf32, #tpu.memory_space<vmem>>, vector<64x1xf32>
    %13 = arith.minimumf %12, %9 : vector<64x1xf32>
    %c0_10 = arith.constant 0 : index
    %c0_11 = arith.constant 0 : index
    %14 = vector.load %arg6[%c0_10, %c0_11] : memref<64x1xf32, #tpu.memory_space<vmem>>, vector<64x1xf32>
    tpu.vector_store %arg6[%c0_10, %c0_11], %13 {strides = array<i32>} : memref<64x1xf32, #tpu.memory_space<vmem>>, vector<64x1xf32>,
    %cst_12 = arith.constant 0.000000e+00 : f32
    %15 = vector.broadcast %cst_12 : f32 to vector<1x128xf32>
    %16 = arith.maximumf %11, %15 : vector<1x128xf32>
    %cst_13 = arith.constant 9.99999993E-9 : f32
    %17 = vector.broadcast %cst_13 : f32 to vector<1x128xf32>
    %18 = arith.addf %16, %17 : vector<1x128xf32>
    %19 = math.sqrt %18 : vector<1x128xf32>
    %c128_i32 = arith.constant 128 : i32
    %20 = arith.muli %arg1, %c128_i32 : i32
    %21 = tpu.iota {dimensions = array<i32: 1>} : vector<1x128xi32>
    %22 = vector.broadcast %20 : i32 to vector<1x128xi32>
    %23 = arith.addi %22, %21 : vector<1x128xi32>
    %c48_i32 = arith.constant 48 : i32
    %24 = vector.broadcast %c48_i32 : i32 to vector<1x128xi32>
    %25 = arith.cmpi slt, %23, %24 : vector<1x128xi32>
    %c0_14 = arith.constant 0 : index
    %c0_15 = arith.constant 0 : index
    %c0_16 = arith.constant 0 : index
    %26 = vector.load %arg5[%c0_14, %c0_15, %c0_16] : memref<1x1x1xf32, #tpu.memory_space<vmem>>, vector<1x1x1xf32>
    %27 = vector.shape_cast %26 : vector<1x1x1xf32> to vector<1x1xf32>
    %cst_17 = arith.constant 0.000000e+00 : f32
    %28 = vector.broadcast %cst_17 : f32 to vector<1x128xf32>
    %29 = arith.select %25, %19, %28 : vector<1x128xi1>, vector<1x128xf32>
    %30 = vector.shape_cast %29 : vector<1x128xf32> to vector<1x1x128xf32>
    %cst_18 = arith.constant dense<0.000000e+00> : vector<1xf32>
    %31 = vector.multi_reduction <add>, %30, %cst_18 [1, 2] : vector<1x1x128xf32> to vector<1xf32>
    %32 = vector.shape_cast %31 : vector<1xf32> to vector<1x1x1xf32>
    %33 = vector.extract %32[0, 0, 0] : f32 from vector<1x1x1xf32>
    %34 = vector.broadcast %33 : f32 to vector<1x1xf32>
    %35 = arith.addf %27, %34 : vector<1x1xf32>
    %c0_19 = arith.constant 0 : index
    %c0_20 = arith.constant 0 : index
    %c0_21 = arith.constant 0 : index
    %36 = vector.load %arg5[%c0_19, %c0_20, %c0_21] : memref<1x1x1xf32, #tpu.memory_space<vmem>>, vector<1x1x1xf32>
    %37 = vector.shape_cast %36 : vector<1x1x1xf32> to vector<1x1xf32>
    %38 = vector.shape_cast %35 : vector<1x1xf32> to vector<1x1x1xf32>
    tpu.vector_store %arg5[%c0_19, %c0_20, %c0_21], %38 {strides = array<i32>} : memref<1x1x1xf32, #tpu.memory_space<vmem>>, vector<1x1x1xf32>,
    %c0_i32_22 = arith.constant 0 : i32
    %39 = arith.cmpi eq, %arg1, %c0_i32_22 : i32
    %40 = arith.extui %39 : i1 to i32
    %c0_i32_23 = arith.constant 0 : i32
    %41 = arith.cmpi ne, %40, %c0_i32_23 : i32
    scf.if %41 {
      %c0_24 = arith.constant 0 : index
      %c0_25 = arith.constant 0 : index
      %42 = vector.load %arg6[%c0_24, %c0_25] : memref<64x1xf32, #tpu.memory_space<vmem>>, vector<64x1xf32>
      %cst_26 = arith.constant 0.000000e+00 : f32
      %43 = vector.broadcast %cst_26 : f32 to vector<64x1xf32>
      %44 = arith.maximumf %42, %43 : vector<64x1xf32>
      %cst_27 = arith.constant 9.99999993E-9 : f32
      %45 = vector.broadcast %cst_27 : f32 to vector<64x1xf32>
      %46 = arith.addf %44, %45 : vector<64x1xf32>
      %47 = math.sqrt %46 : vector<64x1xf32>
      %48 = tpu.iota {dimensions = array<i32: 0>} : vector<64x1xi32>
      %c64_i32 = arith.constant 64 : i32
      %49 = vector.broadcast %c64_i32 : i32 to vector<64x1xi32>
      %50 = arith.cmpi slt, %48, %49 : vector<64x1xi32>
      %cst_28 = arith.constant 0.000000e+00 : f32
      %51 = vector.broadcast %cst_28 : f32 to vector<64x1xf32>
      %52 = arith.select %50, %47, %51 : vector<64x1xi1>, vector<64x1xf32>
      %53 = vector.shape_cast %52 : vector<64x1xf32> to vector<1x64x1xf32>
      %cst_29 = arith.constant dense<0.000000e+00> : vector<1xf32>
      %54 = vector.multi_reduction <add>, %53, %cst_29 [1, 2] : vector<1x64x1xf32> to vector<1xf32>
      %55 = vector.shape_cast %54 : vector<1xf32> to vector<1x1x1xf32>
      %56 = vector.extract %55[0, 0, 0] : f32 from vector<1x1x1xf32>
      %57 = vector.broadcast %56 : f32 to vector<1x1xf32>
      %c0_30 = arith.constant 0 : index
      %c0_31 = arith.constant 0 : index
      %c0_32 = arith.constant 0 : index
      %58 = vector.load %arg4[%c0_30, %c0_31, %c0_32] : memref<1x1x1xf32, #tpu.memory_space<vmem>>, vector<1x1x1xf32>
      %59 = vector.shape_cast %58 : vector<1x1x1xf32> to vector<1x1xf32>
      %60 = vector.shape_cast %57 : vector<1x1xf32> to vector<1x1x1xf32>
      tpu.vector_store %arg4[%c0_30, %c0_31, %c0_32], %60 {strides = array<i32>} : memref<1x1x1xf32, #tpu.memory_space<vmem>>, vector<1x1x1xf32>,
    } else {
    }
    return
  }
  func.func @transform_0(%arg0: i32, %arg1: i32) -> (i32, i32, i32) {
    %c0_i32 = arith.constant 0 : i32
    %c0_i32_0 = arith.constant 0 : i32
    %c0_i32_1 = arith.constant 0 : i32
    return %arg0, %c0_i32, %c0_i32_0 : i32, i32, i32
  }
  func.func @transform_1(%arg0: i32, %arg1: i32) -> (i32, i32, i32) {
    %c0_i32 = arith.constant 0 : i32
    %c0_i32_0 = arith.constant 0 : i32
    return %arg0, %c0_i32, %arg1 : i32, i32, i32
  }
  func.func @transform_2(%arg0: i32, %arg1: i32) -> (i32, i32, i32) {
    %c0_i32 = arith.constant 0 : i32
    %c0_i32_0 = arith.constant 0 : i32
    %c0_i32_1 = arith.constant 0 : i32
    return %arg0, %c0_i32, %c0_i32_0 : i32, i32, i32
  }
  func.func @transform_3(%arg0: i32, %arg1: i32) -> (i32, i32, i32) {
    %c0_i32 = arith.constant 0 : i32
    %c0_i32_0 = arith.constant 0 : i32
    %c0_i32_1 = arith.constant 0 : i32
    return %arg0, %c0_i32, %c0_i32_0 : i32, i32, i32
  }
}

</mosaic_0001>

<bundles_post_ra>
// kernel: tpu_custom_call.1
= control target key start
LH: loop header
LB: loop body
LE: loop exit
PB: predicated region body
PF: predicated region fallthrough
CT: control target
= control target key end

     0   :  { %s1594_s12 = smov 0   ;;  %s1596_s13 = smov 0   ;;  %s1753_s0 = inlined_call_operand.vmem [shape: f32[2,5,64], index: 0, kind: input, shape index: {}]   ;;  %s1754_s1 = inlined_call_operand.vmem [shape: f32[2,5,128], index: 1, kind: input, shape index: {}]   ;;  %s1755_s2 = inlined_call_operand.vmem [shape: f32[2,1,1], index: 2, kind: output, shape index: {0}]   ;;  %s1756_s3 = inlined_call_operand.vmem [shape: f32[2,1,1], index: 3, kind: output, shape index: {1}]  }
   0x1   :  { %s1598_s14 = smov 0  }
   0x2 LB: > { %s26_s15 = sadd.s32 1, %s1566_s13  ;;  %p1357_p0 = scmp.ge.s32.totalorder %s1570_s14, 1  ;;  %s1570_s14 = sphi %s1598_s14, %s14_s14   ;;  %s1566_s13 = sphi %s1596_s13, %s1758_s13   ;;  %s1562_s12 = sphi %s1594_s12, %s1757_s12  }
   0x3   : > { %p28_p1 = scmp.ge.s32.totalorder %s26_s15, 2  ;;  %p165_p2 = scmp.lt.s32.totalorder %s1570_s14, 3 }
   0x5   : > { %s1760_s15 = smov (%p28_p1, %s26_s15), 0  ;;  %p166_p3 = pnand %p1357_p0, %p165_p2 }
   0x6   : > { %p196_p4 = scmp.lt.s32.totalorder (!%p166_p3), %s1562_s12, 1 }
   0x7   : > { %169 = sbr.rel (%p166_p3) target bundleno = 796 (0x31c), region = 28 }
   0xc   : > { %s1762_s12 = smov (!%p196_p4, %s1562_s12), 1  ;;  %vm287_vm0 = vcmask 1044480   ;;  %vm262_vm1 = vcmask 39936   ;;  %vm217_vm2 = vcmask 7168   ;;  %vm1109_vm6 = vcmask 1040384  }
   0xd   : > { %s1358_s16 = sshll.u32 %s1762_s12, 3  ;;  %s1700_s25 = scalar_lea.vmem %s1756_s3, %s1762_s12  ;;  %vm226_vm7 = vcmask 0  }
   0xe   : > { %s199_s19 = scalar_lea.vmem %s1753_s0, %s1358_s16  ;;  %s206_s22 = scalar_lea.vmem %s1754_s1, %s1358_s16 }
   0xf   : > { %v228_v0 = vld [vmem:[%s199_s19] sm:$0x1f]  ;;  %s209_s29 = scalar_lea.vmem %s1755_s2, %s1762_s12 }
  0x10   : > { %v229_v1 = vld [vmem:[%s206_s22] sm:$0x1f]  ;;  %230 = vxpose.xlu0.b32.start.end [1/1] (short) (narrow) %v228_v0, 64  ;;  %v1572_v0 = vmov inf  }
  0x11   : > { %v289_v2 = vsel %vm287_vm0, %v229_v1, 0  ;;  %219 = vst.msk [vmem:[#allocation2 + $0x8] sm:$0xff] %vm217_vm2, %v1572_v0  ;;  %218 = vst.msk [vmem:[#allocation2] sm:$0xff] %vm217_vm2, %v1572_v0 }
  0x12   : > { %v1621_v3 = vand.u32 4294901760, %v289_v2  ;;  %220 = vst.msk [vmem:[#allocation2 + $0x10] sm:$0xff] %vm217_vm2, %v1572_v0  ;;  %221 = vst.msk [vmem:[#allocation2 + $0x18] sm:$0xff] %vm217_vm2, %v1572_v0 }
  0x13   : > { %222 = vst.msk [vmem:[#allocation2 + $0x20] sm:$0xff] %vm217_vm2, %v1572_v0  ;;  %223 = vst.msk [vmem:[#allocation2 + $0x28] sm:$0xff] %vm217_vm2, %v1572_v0 }
  0x14   : > { %v469_v4 = vsub.f32 %v289_v2, %v1621_v3  ;;  %1416 = vmatprep.subr.mxu0 %v1621_v3  ;;  %224 = vst.msk [vmem:[#allocation2 + $0x30] sm:$0xff] %vm217_vm2, %v1572_v0  ;;  %225 = vst.msk [vmem:[#allocation2 + $0x38] sm:$0xff] %vm217_vm2, %v1572_v0 }
  0x15   : > { %1417 = vmatpush3.msra.mxu0 %v1621_v3 }
  0x16   : > { %v1626_v5 = vand.u32 4294901760, %v469_v4  ;;  %1444 = vmatprep.subr.mxu0 %v469_v4 }
  0x18   : > { %v471_v6 = vsub.f32 %v469_v4, %v1626_v5 }
  0x1a   : > { %v472_v7 = vand.u32 4294901760, %v471_v6 }
  0x1c   : > { %1430 = vmatprep.subr.mxu1 %v472_v7 }
  0x1d   : > { %1431 = vmatpush3.msra.mxu1 %v472_v7 }
  0x1e   : > { %1458 = vmatprep.subr.mxu1 %v1621_v3 }
  0x8c   : > { %v246_v8 = vpop.trf.xlu0 }
  0x8d   : > { %v264_v9 = vsel %vm262_vm1, %v246_v8, 0 }
  0x8e   : > { %v1631_v10 = vand.u32 4294901760, %v264_v9 }
  0x90   : > { %v1634_v11 = vsub.f32 %v264_v9, %v1631_v10  ;;  %1432 = vmatprep.mubr.f32.mxu1 %v1631_v10  ;;  %v247_v12 = vpop.trf.xlu0 }
  0x91   : > { %v267_v13 = vsel %vm262_vm1, %v247_v12, 0 }
  0x92   : > { %v1638_v14 = vand.u32 4294901760, %v267_v13  ;;  %v359_v15 = vand.u32 4294901760, %v1634_v11 }
  0x94   : > { %v1642_v16 = vsub.f32 %v267_v13, %v1638_v14  ;;  %1433 = vmatmul.mubr.f32.vlgmr.msra.gmra.mxu1 %v1638_v14  ;;  %v248_v17 = vpop.trf.xlu0  ;;  %v360_v18 = vsub.f32 %v1634_v11, %v359_v15 }
  0x95   : > { %v270_v19 = vsel %vm262_vm1, %v248_v17, 0  ;;  %1459 = vmatpush3.msra.mxu1 %v1621_v3 }
  0x96   : > { %v369_v20 = vand.u32 4294901760, %v1642_v16  ;;  %v1649_v21 = vand.u32 4294901760, %v270_v19  ;;  %v361_v22 = vand.u32 4294901760, %v360_v18  ;;  %1486 = vmatprep.subr.mxu1 %v1621_v3 }
  0x98   : > { %v1653_v23 = vsub.f32 %v270_v19, %v1649_v21  ;;  %1418 = vmatprep.mubr.f32.mxu0 %v361_v22  ;;  %1435 = vmatprep.mubr.f32.mxu1 %v1649_v21  ;;  %v249_v24 = vpop.trf.xlu0  ;;  %v370_v25 = vsub.f32 %v1642_v16, %v369_v20 }
  0x99   : > { %v273_v26 = vsel %vm262_vm1, %v249_v24, 0 }
  0x9a   : > { %v379_v27 = vand.u32 4294901760, %v1653_v23  ;;  %v1659_v28 = vand.u32 4294901760, %v273_v26  ;;  %v371_v29 = vand.u32 4294901760, %v370_v25 }
  0x9c   : > { %v388_v30 = vsub.f32 %v273_v26, %v1659_v28  ;;  %1419 = vmatmul.mubr.f32.vlgmr.msra.gmra.mxu0 %v371_v29  ;;  %1436 = vmatmul.mubr.f32.gmra.mxu1 %v1659_v28  ;;  %v250_v31 = vpop.trf.xlu0  ;;  %v380_v32 = vsub.f32 %v1653_v23, %v379_v27 }
  0x9d   : > { %v276_v33 = vsel %vm262_vm1, %v250_v31, 0  ;;  %1445 = vmatpush3.msra.mxu0 %v469_v4 }
  0x9e   : > { %v389_v34 = vand.u32 4294901760, %v388_v30  ;;  %v1665_v35 = vand.u32 4294901760, %v276_v33  ;;  %v381_v36 = vand.u32 4294901760, %v380_v32  ;;  %1472 = vmatprep.subr.mxu0 %v1626_v5 }
  0xa0   : > { %v398_v37 = vsub.f32 %v276_v33, %v1665_v35  ;;  %1421 = vmatprep.mubr.f32.mxu0 %v381_v36  ;;  %1438 = vmatprep.mubr.f32.mxu1 %v1665_v35  ;;  %v251_v38 = vpop.trf.xlu0  ;;  %v390_v39 = vsub.f32 %v388_v30, %v389_v34 }
  0xa1   : > { %v279_v40 = vsel %vm262_vm1, %v251_v38, 0 }
  0xa2   : > { %v399_v41 = vand.u32 4294901760, %v398_v37  ;;  %v407_v42 = vand.u32 4294901760, %v279_v40  ;;  %v391_v43 = vand.u32 4294901760, %v390_v39 }
  0xa4   : > { %v408_v44 = vsub.f32 %v279_v40, %v407_v42  ;;  %1422 = vmatmul.mubr.f32.gmra.mxu0 %v391_v43  ;;  %1439 = vmatmul.mubr.f32.gmra.mxu1 %v407_v42  ;;  %v252_v45 = vpop.trf.xlu0  ;;  %v400_v46 = vsub.f32 %v398_v37, %v399_v41 }
  0xa5   : > { %v282_v47 = vsel %vm262_vm1, %v252_v45, 0 }
  0xa6   : > { %v409_v48 = vand.u32 4294901760, %v408_v44  ;;  %v417_v49 = vand.u32 4294901760, %v282_v47  ;;  %v401_v50 = vand.u32 4294901760, %v400_v46 }
  0xa8   : > { %v418_v51 = vsub.f32 %v282_v47, %v417_v49  ;;  %1424 = vmatprep.mubr.f32.mxu0 %v401_v50  ;;  %1441 = vmatprep.mubr.f32.mxu1 %v417_v49  ;;  %v253_v52 = vpop.trf.xlu0  ;;  %v410_v53 = vsub.f32 %v408_v44, %v409_v48 }
  0xa9   : > { %v285_v54 = vsel %vm262_vm1, %v253_v52, 0 }
  0xaa   : > { %v419_v55 = vand.u32 4294901760, %v418_v51  ;;  %v427_v56 = vand.u32 4294901760, %v285_v54  ;;  %v411_v57 = vand.u32 4294901760, %v410_v53 }
  0xac   : > { %v428_v58 = vsub.f32 %v285_v54, %v427_v56  ;;  %1425 = vmatmul.mubr.f32.gmra.mxu0 %v411_v57  ;;  %1442 = vmatmul.mubr.f32.gmra.mxu1 %v427_v56  ;;  %v420_v59 = vsub.f32 %v418_v51, %v419_v55 }
  0xad   : > { %1460 = vmatprep.mubr.f32.mxu1 %v359_v15 }
  0xae   : > { %v429_v60 = vand.u32 4294901760, %v428_v58  ;;  %v421_v61 = vand.u32 4294901760, %v420_v59 }
  0xb0   : > { %1427 = vmatprep.mubr.f32.mxu0 %v421_v61  ;;  %1461 = vmatmul.mubr.f32.vlgmr.msra.gmra.mxu1 %v369_v20  ;;  %v430_v62 = vsub.f32 %v428_v58, %v429_v60 }
  0xb1   : > { %1463 = vmatprep.mubr.f32.mxu1 %v379_v27  ;;  %1487 = vmatpush3.msra.mxu1 %v1621_v3 }
  0xb2   : > { %v431_v63 = vand.u32 4294901760, %v430_v62 }
  0xb4   : > { %1428 = vmatmul.mubr.f32.gmra.mxu0 %v431_v63  ;;  %1464 = vmatmul.mubr.f32.gmra.mxu1 %v389_v34 }
  0xb5   : > { %1446 = vmatprep.mubr.f32.mxu0 %v1634_v11  ;;  %1466 = vmatprep.mubr.f32.mxu1 %v399_v41 }
  0xb8   : > { %1447 = vmatmul.mubr.f32.vlgmr.msra.gmra.mxu0 %v1642_v16  ;;  %1467 = vmatmul.mubr.f32.gmra.mxu1 %v409_v48 }
  0xb9   : > { %1473 = vmatpush3.msra.mxu0 %v1626_v5  ;;  %1449 = vmatprep.mubr.f32.mxu0 %v1653_v23 }
  0xba   : > { %1469 = vmatprep.mubr.f32.mxu1 %v419_v55 }
  0xbc   : > { %1450 = vmatmul.mubr.f32.gmra.mxu0 %v388_v30  ;;  %1470 = vmatmul.mubr.f32.gmra.mxu1 %v429_v60 }
  0xbd   : > { %1452 = vmatprep.mubr.f32.mxu0 %v398_v37  ;;  %1488 = vmatprep.mubr.f32.mxu1 %v1631_v10 }
  0xc0   : > { %1453 = vmatmul.mubr.f32.gmra.mxu0 %v408_v44  ;;  %1489 = vmatmul.mubr.f32.vlgmr.msra.gmra.mxu1 %v1638_v14 }
  0xc1   : > { %1455 = vmatprep.mubr.f32.mxu0 %v418_v51  ;;  %1491 = vmatprep.mubr.f32.mxu1 %v1649_v21 }
  0xc4   : > { %1456 = vmatmul.mubr.f32.gmra.mxu0 %v428_v58  ;;  %1492 = vmatmul.mubr.f32.gmra.mxu1 %v1659_v28 }
  0xc5   : > { %1474 = vmatprep.mubr.f32.mxu0 %v1631_v10  ;;  %1494 = vmatprep.mubr.f32.mxu1 %v1665_v35 }
  0xc8   : > { %1475 = vmatmul.mubr.f32.vlgmr.msra.gmra.mxu0 %v1638_v14  ;;  %1495 = vmatmul.mubr.f32.gmra.mxu1 %v407_v42 }
  0xc9   : > { %1477 = vmatprep.mubr.f32.mxu0 %v1649_v21  ;;  %1497 = vmatprep.mubr.f32.mxu1 %v417_v49 }
  0xcc   : > { %1478 = vmatmul.mubr.f32.gmra.mxu0 %v1659_v28  ;;  %1498 = vmatmul.mubr.f32.gmra.mxu1 %v427_v56 }
  0xcd   : > { %1480 = vmatprep.mubr.f32.mxu0 %v1665_v35 }
  0xd0   : > { %1481 = vmatmul.mubr.f32.gmra.mxu0 %v407_v42 }
  0xd1   : > { %1483 = vmatprep.mubr.f32.mxu0 %v417_v49 }
  0xd4   : > { %1484 = vmatmul.mubr.f32.gmra.mxu0 %v427_v56 }
 0x154   : > { %v1434_v1 = vpop.f32.mrf.mxu1 }
 0x156   : > { %v509_v2 = vpop.f32.mrf.mxu1 }
 0x15c   : > { %v1437_v3 = vpop.f32.mrf.mxu1  ;;  %v1420_v4 = vpop.f32.mrf.mxu0 }
 0x15d   : > { %v516_v31 = vadd.f32 %v1434_v1, %v1420_v4 }
 0x15e   : > { %v521_v5 = vpop.f32.mrf.mxu1  ;;  %v363_v6 = vpop.f32.mrf.mxu0 }
 0x15f   : > { %v510_v34 = vadd.f32 %v509_v2, %v363_v6 }
 0x164   : > { %v1440_v7 = vpop.f32.mrf.mxu1  ;;  %v1423_v8 = vpop.f32.mrf.mxu0 }
 0x165   : > { %v528_v38 = vadd.f32 %v1437_v3, %v1423_v8 }
 0x166   : > { %v533_v9 = vpop.f32.mrf.mxu1  ;;  %v383_v10 = vpop.f32.mrf.mxu0 }
 0x167   : > { %v522_v41 = vadd.f32 %v521_v5, %v383_v10 }
 0x16c   : > { %v1443_v11 = vpop.f32.mrf.mxu1  ;;  %v1426_v12 = vpop.f32.mrf.mxu0 }
 0x16d   : > { %v540_v49 = vadd.f32 %v1440_v7, %v1426_v12 }
 0x16e   : > { %v545_v13 = vpop.f32.mrf.mxu1  ;;  %v403_v15 = vpop.f32.mrf.mxu0 }
 0x16f   : > { %v534_v51 = vadd.f32 %v533_v9, %v403_v15 }
 0x170   : > { %v1462_v14 = vpop.f32.mrf.mxu1 }
 0x172   : > { %v748_v16 = vpop.f32.mrf.mxu1 }
 0x174   : > { %v1429_v17 = vpop.f32.mrf.mxu0  ;;  %v1465_v18 = vpop.f32.mrf.mxu1 }
 0x175   : > { %v552_v55 = vadd.f32 %v1443_v11, %v1429_v17 }
 0x176   : > { %v423_v19 = vpop.f32.mrf.mxu0  ;;  %v764_v20 = vpop.f32.mrf.mxu1 }
 0x177   : > { %v546_v0 = vadd.f32 %v545_v13, %v423_v19 }
 0x178   : > { %v1448_v21 = vpop.f32.mrf.mxu0  ;;  %v1468_v22 = vpop.f32.mrf.mxu1 }
 0x179   : > { %v633_v35 = vadd.f32 %v1448_v21, %v516_v31 }
 0x17a   : > { %v625_v23 = vpop.f32.mrf.mxu0  ;;  %v780_v24 = vpop.f32.mrf.mxu1 }
 0x17b   : > { %v626_v39 = vadd.f32 %v625_v23, %v510_v34  ;;  %v757_v43 = vadd.f32 %v1462_v14, %v633_v35 }
 0x17c   : > { %v1451_v25 = vpop.f32.mrf.mxu0  ;;  %v1471_v26 = vpop.f32.mrf.mxu1 }
 0x17d   : > { %v647_v42 = vadd.f32 %v1451_v25, %v528_v38  ;;  %v749_v48 = vadd.f32 %v748_v16, %v626_v39 }
 0x17e   : > { %v639_v27 = vpop.f32.mrf.mxu0  ;;  %v796_v28 = vpop.f32.mrf.mxu1 }
 0x17f   : > { %v640_v46 = vadd.f32 %v639_v27, %v522_v41  ;;  %v773_v53 = vadd.f32 %v1465_v18, %v647_v42 }
 0x180   : > { %v1454_v29 = vpop.f32.mrf.mxu0  ;;  %v1490_v30 = vpop.f32.mrf.mxu1 }
 0x181   : > { %v661_v56 = vadd.f32 %v1454_v29, %v540_v49  ;;  %v765_v61 = vadd.f32 %v764_v20, %v640_v46  ;;  %v1573_v49 = vmov 0.0  }
 0x182   : > { %v653_v32 = vpop.f32.mrf.mxu0  ;;  %v992_v33 = vpop.f32.mrf.mxu1  ;;  %227 = vst.msk [vmem:[%s1700_s25] sm:$0x1] %vm226_vm7, %v1573_v49 }
 0x183   : > { %v654_v59 = vadd.f32 %v653_v32, %v534_v51  ;;  %v789_v7 = vadd.f32 %v1468_v22, %v661_v56 }
 0x184   : > { %v1457_v36 = vpop.f32.mrf.mxu0  ;;  %v1493_v37 = vpop.f32.mrf.mxu1 }
 0x185   : > { %v675_v1 = vadd.f32 %v1457_v36, %v552_v55  ;;  %v781_v8 = vadd.f32 %v780_v24, %v654_v59  ;;  %v1070_v55 = vld [vmem:[#allocation2 + $0x18] sm:$0xff]  ;;  %v1069_v59 = vld [vmem:[#allocation2 + $0x10] sm:$0xff] }
 0x186   : > { %v667_v40 = vpop.f32.mrf.mxu0  ;;  %v1004_v44 = vpop.f32.mrf.mxu1 }
 0x187   : > { %v668_v6 = vadd.f32 %v667_v40, %v546_v0  ;;  %v805_v12 = vadd.f32 %v1471_v26, %v675_v1  ;;  %v1102_v40 = vlaneseq }
 0x188   : > { %v1476_v45 = vpop.f32.mrf.mxu0  ;;  %v1496_v57 = vpop.f32.mrf.mxu1 }
 0x189   : > { %v885_v47 = vadd.f32 %v1476_v45, %v757_v43  ;;  %v797_v13 = vadd.f32 %v796_v28, %v668_v6  ;;  %v1103_v41 = vand.u32 127, %v1102_v40  ;;  %v1071_v6 = vld [vmem:[#allocation2 + $0x20] sm:$0xff] }
 0x18a   : > { %v878_v50 = vpop.f32.mrf.mxu0  ;;  %v1016_v4 = vpop.f32.mrf.mxu1 }
 0x18b   : > { %v879_v52 = vadd.f32 %v878_v50, %v749_v48  ;;  %v999_v54 = vadd.f32 %v1490_v30, %v885_v47  ;;  %vm1106_vm4 = vcmp.lt.s32.totalorder %v1103_v41, 48  ;;  %v1068_v50 = vld [vmem:[#allocation2 + $0x8] sm:$0xff] }
 0x18c   : > { %v1479_v58 = vpop.f32.mrf.mxu0  ;;  %v1499_v15 = vpop.f32.mrf.mxu1 }
 0x18d   : > { %v897_v60 = vadd.f32 %v1479_v58, %v773_v53  ;;  %1040 = vmin.xlane.f32.xlu1 %v999_v54  ;;  %v993_v62 = vadd.f32 %v992_v33, %v879_v52  ;;  %v1067_v52 = vld [vmem:[#allocation2] sm:$0xff] }
 0x18e   : > { %v890_v63 = vpop.f32.mrf.mxu0  ;;  %v1028_v25 = vpop.f32.mrf.mxu1 }
 0x18f   : > { %v891_v2 = vadd.f32 %v890_v63, %v765_v61  ;;  %1038 = vmin.xlane.f32.xlu0 %v993_v62  ;;  %v1011_v3 = vadd.f32 %v1493_v37, %v897_v60 }
 0x190   : > { %v1482_v5 = vpop.f32.mrf.mxu0 }
 0x191   : > { %1044 = vmin.xlane.f32.xlu1 %v1011_v3  ;;  %v909_v10 = vadd.f32 %v1482_v5, %v789_v7  ;;  %v1005_v14 = vadd.f32 %v1004_v44, %v891_v2 }
 0x192   : > { %v902_v9 = vpop.f32.mrf.mxu0 }
 0x193   : > { %v903_v11 = vadd.f32 %v902_v9, %v781_v8  ;;  %v1023_v21 = vadd.f32 %v1496_v57, %v909_v10 }
 0x194   : > { %v1485_v16 = vpop.f32.mrf.mxu0 }
 0x195   : > { %v921_v17 = vadd.f32 %v1485_v16, %v805_v12  ;;  %1042 = vmin.xlane.f32.xlu1 %v1005_v14  ;;  %v1017_v18 = vadd.f32 %v1016_v4, %v903_v11  ;;  %v1055_v24 = vmin.f32 %v999_v54, %v1023_v21 }
 0x196   : > { %v914_v19 = vpop.f32.mrf.mxu0 }
 0x197   : > { %v915_v20 = vadd.f32 %v914_v19, %v797_v13  ;;  %v1035_v23 = vadd.f32 %v1499_v15, %v921_v17  ;;  %v1054_v22 = vmin.f32 %v993_v62, %v1017_v18  ;;  %v1072_v62 = vld [vmem:[#allocation2 + $0x28] sm:$0xff]  ;;  %v1074_v19 = vld [vmem:[#allocation2 + $0x38] sm:$0xff] }
 0x199   : > { %1048 = vmin.xlane.f32.xlu1 %v1023_v21  ;;  %v1029_v27 = vadd.f32 %v1028_v25, %v915_v20  ;;  %v1057_v30 = vmin.f32 %v1011_v3, %v1035_v23  ;;  %v1058_v26 = vmin.f32 %v1054_v22, %v1055_v24 }
 0x19b   : > { %v1056_v29 = vmin.f32 %v1005_v14, %v1029_v27  ;;  %v1073_v14 = vld [vmem:[#allocation2 + $0x30] sm:$0xff] }
 0x19d   : > { %1046 = vmin.xlane.f32.xlu1 %v1017_v18  ;;  %v1059_v31 = vmin.f32 %v1056_v29, %v1057_v30 }
 0x19f   : > { %v1060_v32 = vmin.f32 %v1058_v26, %v1059_v31 }
 0x1a1   : > { %1050 = vmin.xlane.f32.xlu1 %v1029_v27  ;;  %v1061_v33 = vrot.slane %v1060_v32, 4 }
 0x1a3   : > { %v1062_v34 = vmin.f32 %v1060_v32, %v1061_v33 }
 0x1a5   : > { %1052 = vmin.xlane.f32.xlu1 %v1035_v23  ;;  %v1063_v28 = vrot.slane %v1062_v34, 2 }
 0x1a7   : > { %v1064_v35 = vmin.f32 %v1062_v34, %v1063_v28 }
 0x1a9   : > { %v1065_v36 = vrot.slane %v1064_v35, 1 }
 0x1ab   : > { %v1066_v37 = vmin.f32 %v1064_v35, %v1065_v36 }
 0x1ad   : > { %v1092_v38 = vmax.f32 %v1066_v37, 0.0 }
 0x1af   : > { %v1093_v39 = vadd.f32 1e-08, %v1092_v38 }
 0x1b1   : > { %1530 = vrsqrt.f32 %v1093_v39  ;;  %vm1096_vm3 = vcmp.eq.f32.partialorder %v1093_v39, inf  ;;  %v1099_v44 = vand.u32 2147483648, %v1093_v39  ;;  %vm1098_vm5 = vcmp.eq.f32.partialorder %v1093_v39, 0.0 }
 0x1be   : > { %v1531_v42 = vpop.eup %1530 }
 0x1bf   : > { %v1095_v43 = vmul.f32 %v1531_v42, %v1093_v39 }
 0x1c1   : > { %v1097_v45 = vsel %vm1096_vm3, %v1093_v39, %v1095_v43 }
 0x1c2   : > { %v1100_v46 = vsel %vm1098_vm5, %v1099_v44, %v1097_v45 }
 0x1c3   : > { %v1108_v47 = vsel %vm1106_vm4, %v1100_v46, 0.0 }
 0x1c4   : > { %v1110_v48 = vsel %vm1109_vm6, %v1108_v47, 0.0 }
 0x1c5   : > { %1111 = vadd.xlane.f32.xlu1 %v1110_v48 }
 0x216   : > { %v1041_v51 = vpop.xlane.xlu1 %1040 }
 0x217   : > { %v1076_v53 = vmin.f32 %v1068_v50, %v1041_v51 }
 0x218   : > { %v1039_v54 = vpop.xlane.xlu0 %1038 }
 0x219   : > { %1085 = vst.msk [vmem:[#allocation2 + $0x8] sm:$0xff] %vm217_vm2, %v1076_v53  ;;  %v1075_v56 = vmin.f32 %v1067_v52, %v1039_v54 }
 0x21a   : > { %v1045_v57 = vpop.xlane.xlu1 %1044 }
 0x21b   : > { %1084 = vst.msk [vmem:[#allocation2] sm:$0xff] %vm217_vm2, %v1075_v56  ;;  %v1078_v58 = vmin.f32 %v1070_v55, %v1045_v57 }
 0x21d   : > { %1087 = vst.msk [vmem:[#allocation2 + $0x18] sm:$0xff] %vm217_vm2, %v1078_v58 }
 0x21e   : > { %v1043_v60 = vpop.xlane.xlu1 %1042 }
 0x21f   : > { %v1077_v61 = vmin.f32 %v1069_v59, %v1043_v60 }
 0x220   : > { %v1128_v63 = vld [vmem:[#allocation2 + $0x8] sm:$0xff] }
 0x221   : > { %1086 = vst.msk [vmem:[#allocation2 + $0x10] sm:$0xff] %vm217_vm2, %v1077_v61  ;;  %v1136_v0 = vmax.f32 %v1128_v63, 0.0 }
 0x222   : > { %v1049_v1 = vpop.xlane.xlu1 %1048  ;;  %v1127_v2 = vld [vmem:[#allocation2] sm:$0xff] }
 0x223   : > { %v1080_v3 = vmin.f32 %v1072_v62, %v1049_v1  ;;  %v1135_v4 = vmax.f32 %v1127_v2, 0.0  ;;  %v1144_v5 = vadd.f32 1e-08, %v1136_v0 }
 0x224   : > { %v1130_v7 = vld [vmem:[#allocation2 + $0x18] sm:$0xff] }
 0x225   : > { %1089 = vst.msk [vmem:[#allocation2 + $0x28] sm:$0xff] %vm217_vm2, %v1080_v3  ;;  %v1138_v8 = vmax.f32 %v1130_v7, 0.0  ;;  %v1143_v9 = vadd.f32 1e-08, %v1135_v4  ;;  %1532 = vrsqrt.f32 %v1144_v5  ;;  %vm1160_vm9 = vcmp.eq.f32.partialorder %v1144_v5, inf }
 0x226   : > { %v1047_v10 = vpop.xlane.xlu1 %1046  ;;  %v1163_v43 = vand.u32 2147483648, %v1144_v5  ;;  %vm1162_vm11 = vcmp.eq.f32.partialorder %v1144_v5, 0.0 }
 0x227   : > { %v1079_v11 = vmin.f32 %v1071_v6, %v1047_v10  ;;  %v1709_v12 = vadd.f32 1e-08, %v1138_v8  ;;  %1534 = vrsqrt.f32 %v1143_v9  ;;  %vm1153_vm8 = vcmp.eq.f32.partialorder %v1143_v9, inf }
 0x228   : > { %v1129_v15 = vld [vmem:[#allocation2 + $0x10] sm:$0xff]  ;;  %v1156_v38 = vand.u32 2147483648, %v1143_v9  ;;  %vm1155_vm10 = vcmp.eq.f32.partialorder %v1143_v9, 0.0 }
 0x229   : > { %1088 = vst.msk [vmem:[#allocation2 + $0x20] sm:$0xff] %vm217_vm2, %v1079_v11  ;;  %v1137_v16 = vmax.f32 %v1129_v15, 0.0  ;;  %1536 = vrsqrt.f32 %v1709_v12  ;;  %vm1174_vm14 = vcmp.eq.f32.partialorder %v1709_v12, inf  ;;  %v1177_v57 = vand.u32 2147483648, %v1709_v12 }
 0x22a   : > { %v1051_v17 = vpop.xlane.xlu1 %1050  ;;  %vm1176_vm15 = vcmp.eq.f32.partialorder %v1709_v12, 0.0 }
 0x22b   : > { %v1081_v13 = vmin.f32 %v1073_v14, %v1051_v17  ;;  %v1145_v18 = vadd.f32 1e-08, %v1137_v16 }
 0x22c   : > { %v1132_v20 = vld [vmem:[#allocation2 + $0x28] sm:$0xff] }
 0x22d   : > { %1090 = vst.msk [vmem:[#allocation2 + $0x30] sm:$0xff] %vm217_vm2, %v1081_v13  ;;  %v1140_v21 = vmax.f32 %v1132_v20, 0.0  ;;  %1538 = vrsqrt.f32 %v1145_v18  ;;  %vm1167_vm12 = vcmp.eq.f32.partialorder %v1145_v18, inf  ;;  %v1170_v48 = vand.u32 2147483648, %v1145_v18 }
 0x22e   : > { %v1053_v23 = vpop.xlane.xlu1 %1052  ;;  %vm1169_vm13 = vcmp.eq.f32.partialorder %v1145_v18, 0.0 }
 0x22f   : > { %v1082_v25 = vmin.f32 %v1074_v19, %v1053_v23  ;;  %v1714_v22 = vadd.f32 1e-08, %v1140_v21 }
 0x230   : > { %v1131_v27 = vld [vmem:[#allocation2 + $0x20] sm:$0xff] }
 0x231   : > { %1091 = vst.msk [vmem:[#allocation2 + $0x38] sm:$0xff] %vm217_vm2, %v1082_v25  ;;  %v1139_v24 = vmax.f32 %v1131_v27, 0.0  ;;  %1540 = vrsqrt.f32 %v1714_v22  ;;  %vm1188_vm0 = vcmp.eq.f32.partialorder %v1714_v22, inf  ;;  %v1191_v1 = vand.u32 2147483648, %v1714_v22 }
 0x232   : > { %v1533_v29 = vpop.eup %1532  ;;  %vm1190_vm4 = vcmp.eq.f32.partialorder %v1714_v22, 0.0 }
 0x233   : > { %v1147_v30 = vadd.f32 1e-08, %v1139_v24  ;;  %v1159_v34 = vmul.f32 %v1533_v29, %v1144_v5 }
 0x234   : > { %v1535_v26 = vpop.eup %1534  ;;  %v1133_v31 = vld [vmem:[#allocation2 + $0x30] sm:$0xff] }
 0x235   : > { %v1141_v32 = vmax.f32 %v1133_v31, 0.0  ;;  %v1152_v33 = vmul.f32 %v1535_v26, %v1143_v9  ;;  %1542 = vrsqrt.f32 %v1147_v30  ;;  %v1161_v40 = vsel %vm1160_vm9, %v1144_v5, %v1159_v34 }
 0x236   : > { %v1537_v36 = vpop.eup %1536  ;;  %v1164_v47 = vsel %vm1162_vm11, %v1163_v43, %v1161_v40  ;;  %vm1181_vm1 = vcmp.eq.f32.partialorder %v1147_v30, inf  ;;  %v1184_v0 = vand.u32 2147483648, %v1147_v30  ;;  %vm1183_vm3 = vcmp.eq.f32.partialorder %v1147_v30, 0.0 }
 0x237   : > { %v1149_v28 = vadd.f32 1e-08, %v1141_v32  ;;  %v1154_v35 = vsel %vm1153_vm8, %v1143_v9, %v1152_v33  ;;  %v1173_v46 = vmul.f32 %v1537_v36, %v1709_v12  ;;  %v1233_v55 = vsel %vm217_vm2, %v1164_v47, 0.0  ;;  %v1107_v33 = vld [vmem:[%s1700_s25] sm:$0x1] }
 0x238   : > { %v1134_v37 = vld [vmem:[#allocation2 + $0x38] sm:$0xff]  ;;  %v1157_v42 = vsel %vm1155_vm10, %v1156_v38, %v1154_v35 }
 0x239   : > { %v1142_v39 = vmax.f32 %v1134_v37, 0.0  ;;  %1544 = vrsqrt.f32 %v1149_v28  ;;  %v1232_v50 = vsel %vm217_vm2, %v1157_v42, 0.0  ;;  %v1175_v53 = vsel %vm1174_vm14, %v1709_v12, %v1173_v46 }
 0x23a   : > { %v1539_v41 = vpop.eup %1538  ;;  %v1234_v58 = vadd.f32 %v1233_v55, %v1232_v50  ;;  %v1178_v60 = vsel %vm1176_vm15, %v1177_v57, %v1175_v53  ;;  %vm1195_vm5 = vcmp.eq.f32.partialorder %v1149_v28, inf  ;;  %v1198_v10 = vand.u32 2147483648, %v1149_v28 }
 0x23b   : > { %v1150_v44 = vadd.f32 1e-08, %v1142_v39  ;;  %v1166_v45 = vmul.f32 %v1539_v41, %v1145_v18  ;;  %v1237_v3 = vsel %vm217_vm2, %v1178_v60, 0.0  ;;  %vm1197_vm6 = vcmp.eq.f32.partialorder %v1149_v28, 0.0 }
 0x23d   : > { %v1168_v49 = vsel %vm1167_vm12, %v1145_v18, %v1166_v45  ;;  %1546 = vrsqrt.f32 %v1150_v44  ;;  %vm1202_vm8 = vcmp.eq.f32.partialorder %v1150_v44, inf  ;;  %v1205_v19 = vand.u32 2147483648, %v1150_v44 }
 0x23e   : > { %v1541_v51 = vpop.eup %1540  ;;  %v1171_v52 = vsel %vm1169_vm13, %v1170_v48, %v1168_v49  ;;  %vm1204_vm9 = vcmp.eq.f32.partialorder %v1150_v44, 0.0 }
 0x23f   : > { %v1187_v54 = vmul.f32 %v1541_v51, %v1714_v22  ;;  %v1235_v56 = vsel %vm217_vm2, %v1171_v52, 0.0 }
 0x240   : > { %v1236_v61 = vadd.f32 %v1235_v56, %v1234_v58 }
 0x241   : > { %v1189_v63 = vsel %vm1188_vm0, %v1714_v22, %v1187_v54 }
 0x242   : > { %v1543_v59 = vpop.eup %1542  ;;  %v1192_v6 = vsel %vm1190_vm4, %v1191_v1, %v1189_v63  ;;  %v1238_v7 = vadd.f32 %v1237_v3, %v1236_v61 }
 0x243   : > { %v1180_v62 = vmul.f32 %v1543_v59, %v1147_v30  ;;  %v1241_v14 = vsel %vm217_vm2, %v1192_v6, 0.0 }
 0x245   : > { %v1182_v2 = vsel %vm1181_vm1, %v1147_v30, %v1180_v62 }
 0x246   : > { %v1545_v4 = vpop.eup %1544  ;;  %v1185_v5 = vsel %vm1183_vm3, %v1184_v0, %v1182_v2 }
 0x247   : > { %v1194_v8 = vmul.f32 %v1545_v4, %v1149_v28  ;;  %v1239_v9 = vsel %vm217_vm2, %v1185_v5, 0.0 }
 0x248   : > { %v1240_v11 = vadd.f32 %v1239_v9, %v1238_v7 }
 0x249   : > { %v1196_v12 = vsel %vm1195_vm5, %v1149_v28, %v1194_v8 }
 0x24a   : > { %v1547_v15 = vpop.eup %1546  ;;  %v1199_v16 = vsel %vm1197_vm6, %v1198_v10, %v1196_v12  ;;  %v1242_v17 = vadd.f32 %v1241_v14, %v1240_v11 }
 0x24b   : > { %v1201_v13 = vmul.f32 %v1547_v15, %v1150_v44  ;;  %v1243_v18 = vsel %vm217_vm2, %v1199_v16, 0.0 }
 0x24c   : > { %v1244_v25 = vadd.f32 %v1243_v18, %v1242_v17 }
 0x24d   : > { %v1203_v20 = vsel %vm1202_vm8, %v1150_v44, %v1201_v13 }
 0x24e   : > { %v1112_v21 = vpop.xlane.xlu1 %1111  ;;  %v1206_v23 = vsel %vm1204_vm9, %v1205_v19, %v1203_v20 }
 0x24f   : > { %v1113_v22 = vrot.slane %v1112_v21, 4  ;;  %v1245_v27 = vsel %vm217_vm2, %v1206_v23, 0.0 }
 0x250   : > { %v1246_v24 = vadd.f32 %v1245_v27, %v1244_v25 }
 0x251   : > { %v1114_v29 = vadd.f32 %v1113_v22, %v1112_v21 }
 0x252   : > { %1247 = vadd.xlane.f32.xlu1 %v1246_v24 }
 0x253   : > { %v1115_v30 = vrot.slane %v1114_v29, 2 }
 0x255   : > { %v1116_v26 = vadd.f32 %v1115_v30, %v1114_v29 }
 0x257   : > { %v1117_v31 = vrot.slane %v1116_v26, 1 }
 0x259   : > { %v1118_v32 = vadd.f32 %v1117_v31, %v1116_v26 }
 0x25b   : > { %1500 = vpush %v1118_v32 }
 0x28c   : > { %s1501_s26 = spop %1500 }
 0x28d   : > { %v1120_v34 = vstv %s1501_s26 }
 0x28e   : > { %v1121_v28 = vadd.f32 %v1120_v34, %v1107_v33 }
 0x290   : > { %1123 = vst.msk [vmem:[%s1700_s25] sm:$0x1] %vm226_vm7, %v1121_v28 }
 0x2db   : > { %v1248_v35 = vpop.xlane.xlu1 %1247 }
 0x2dc   : > { %v1249_v36 = vrot.slane %v1248_v35, 4 }
 0x2de   : > { %v1250_v37 = vadd.f32 %v1249_v36, %v1248_v35 }
 0x2e0   : > { %v1251_v38 = vrot.slane %v1250_v37, 2 }
 0x2e2   : > { %v1252_v39 = vadd.f32 %v1251_v38, %v1250_v37 }
 0x2e4   : > { %v1253_v40 = vrot.slane %v1252_v39, 1 }
 0x2e6   : > { %v1254_v41 = vadd.f32 %v1253_v40, %v1252_v39 }
 0x2e8   : > { %1502 = vpush %v1254_v41 }
 0x319   : > { %s1503_s30 = spop %1502 }
 0x31a   : > { %v1256_v42 = vstv %s1503_s30 }
 0x31b   : > { %1257 = vst.msk [vmem:[%s209_s29] sm:$0x1] %vm226_vm7, %v1256_v42 }
 0x31c PF: > { %s14_s14 = sadd.s32 1, %s1570_s14   ;;  %s1757_s12 = smov %s1566_s13 }
 0x31d   : > { %p11_p5 = scmp.ge.s32.totalorder %s14_s14, 4   ;;  %s1758_s13 = smov %s1760_s15 }
 0x31f   :  { %13 = sbr.rel (!%p11_p5) target bundleno = 2 (0x2), region = 81 }

</bundles_post_ra>
